<compile_context>
chip_gen: v5e
topology: v5e:2x2
jax: 0.10.0
libtpu: 0.0.40
codegen_flags: <defaults>
</compile_context>

<pallas_src>
import functools

import jax
import jax.numpy as jnp
from jax.experimental import pallas as pl
from jax.experimental.pallas import tpu as pltpu


def _conv3x3_relu_kernel(x_ref, w_ref, b_ref, o_ref, *, wp: int):
    # x_ref: (1, Cin, L)       bf16  zero-extended, flattened, spatially padded image
    # w_ref: (Cout, 9*Cin)     bf16  tap-major / channel-minor
    # b_ref: (Cout, 1)         f32
    # o_ref: (1, Cout, S_out)  f32   conv+bias+relu on the (flattened) padded grid
    s_out = o_ref.shape[2]
    # Gather the 9 taps as static lane-offset slices of the flat buffer and fold
    # them into the K dimension -> one (Cout, 9*Cin) @ (9*Cin, S_out) matmul.
    taps = []
    for kh in range(3):
        for kw in range(3):
            off = kh * wp + kw
            taps.append(x_ref[0, :, off:off + s_out])          # (Cin, S_out) bf16
    rhs = jnp.concatenate(taps, axis=0)                        # (9*Cin, S_out) bf16
    acc = jnp.dot(w_ref[...], rhs,
                  preferred_element_type=jnp.float32)          # (Cout, S_out) f32
    acc = jnp.maximum(acc + b_ref[...], 0.0)                   # bias + ReLU, f32 VPU
    o_ref[0, :, :] = acc.astype(o_ref.dtype)


def conv_forward(x_nchw, weight, bias):
    """Equivalent of Conv(inp_dim, out_dim).forward(x) with bn=False, relu=True.

    x_nchw: (B, Cin, H, W) f32; weight: (Cout, Cin, 3, 3) f32; bias: (Cout,) f32
    returns (B, Cout, H, W) f32
    """
    B, Cin, H, W = x_nchw.shape
    Cout = weight.shape[0]
    Hp, Wp = H + 2, W + 2              # spatial zero padding of 1 (=(k-1)//2)
    S = Hp * Wp                        # flattened padded grid
    S_out = -(-S // 128) * 128         # round up -> lane-dense, unmasked stores
    halo = Wp + 1                      # flat offset of the center tap
    max_off = 2 * Wp + 2               # largest tap offset (kh=kw=2)
    L = -(-(max_off + S_out) // 128) * 128

    # bf16 matmul operands; accumulation stays f32 inside the kernel.
    xb = x_nchw.astype(jnp.bfloat16)
    wb = weight.astype(jnp.bfloat16)

    # Zero-pad spatially, flatten the padded grid (free reshape), and add a flat
    # halo so every tap slice is statically in-bounds.  No transposes needed.
    x_pad = jnp.pad(xb, ((0, 0), (0, 0), (1, 1), (1, 1)))           # (B, Cin, Hp, Wp)
    x_flat = x_pad.reshape(B, Cin, S)
    x_ext = jnp.pad(x_flat, ((0, 0), (0, 0), (halo, L - halo - S)))  # (B, Cin, L)

    # (Cout, Cin, 3, 3) -> (Cout, 3, 3, Cin) -> (Cout, 9*Cin); row order matches
    # the tap concatenation order inside the kernel.
    w2d = jnp.transpose(wb, (0, 2, 3, 1)).reshape(Cout, 9 * Cin)
    b2d = bias.astype(jnp.float32).reshape(Cout, 1)

    kernel = functools.partial(_conv3x3_relu_kernel, wp=Wp)

    out_flat = pl.pallas_call(
        kernel,
        out_shape=jax.ShapeDtypeStruct((B, Cout, S_out), jnp.float32),
        grid_spec=pltpu.PrefetchScalarGridSpec(
            num_scalar_prefetch=0,
            # One grid cell per batch element (2 parallel cells -> both v7x TCs).
            # For large H*W the flat spatial axis would additionally be tiled
            # into halo'd row blocks; unnecessary at these sizes.
            grid=(B,),
            in_specs=[
                pl.BlockSpec((1, Cin, L), lambda b: (b, 0, 0)),
                pl.BlockSpec((Cout, 9 * Cin), lambda b: (0, 0)),
                pl.BlockSpec((Cout, 1), lambda b: (0, 0)),
            ],
            out_specs=pl.BlockSpec((1, Cout, S_out), lambda b: (b, 0, 0)),
        ),
        compiler_params=pltpu.CompilerParams(
            dimension_semantics=("parallel",),
            vmem_limit_bytes=32 * 1024 * 1024,   # well under v7x's 64 MiB VMEM
        ),
    )(x_ext, w2d, b2d)

    # Drop the lane round-up and the (garbage) border of the padded grid.
    out = out_flat[:, :, :S].reshape(B, Cout, Hp, Wp)[:, :, 1:H + 1, 1:W + 1]
    return out


if __name__ == "__main__":
    # Small shapes consistent with the module: batch=2, inp_dim=4, out_dim=8, 16x16
    B, Cin, Cout, H, W = 2, 4, 8, 16, 16
    key = jax.random.PRNGKey(0)
    kx, kw, kb = jax.random.split(key, 3)

    x = jax.random.normal(kx, (B, Cin, H, W), dtype=jnp.float32)

    # Deterministic parameter init (PyTorch-style uniform bound for Conv2d)
    fan_in = Cin * 3 * 3
    bound = 1.0 / (fan_in ** 0.5)
    weight = jax.random.uniform(kw, (Cout, Cin, 3, 3), jnp.float32, -bound, bound)
    bias = jax.random.uniform(kb, (Cout,), jnp.float32, -bound, bound)

    out = jax.block_until_ready(conv_forward(x, weight, bias))

    # Reference: XLA conv + bias + ReLU on the same bf16-rounded operands
    # (the kernel feeds bf16 to the MXU with f32 accumulation).
    xr = x.astype(jnp.bfloat16).astype(jnp.float32)
    wr = weight.astype(jnp.bfloat16).astype(jnp.float32)
    ref = jax.lax.conv_general_dilated(
        xr, wr, window_strides=(1, 1), padding=((1, 1), (1, 1)),
        dimension_numbers=("NCHW", "OIHW", "NCHW"),
        precision=jax.lax.Precision.HIGHEST,
    ) + bias[None, :, None, None]
    ref = jnp.maximum(ref, 0.0)

    assert out.shape == (B, Cout, H, W)
    assert jnp.allclose(out, ref, atol=1e-3, rtol=1e-3), float(jnp.max(jnp.abs(out - ref)))

    print("KERNEL_OK")
</pallas_src>

<mosaic_0001>
module attributes {stable_mosaic.version = 11 : i64} {
  func.func @_conv3x3_relu_kernel(%arg0: i32, %arg1: memref<1x4x512xbf16, #tpu.memory_space<vmem>>, %arg2: memref<8x36xbf16, #tpu.memory_space<vmem>>, %arg3: memref<8x1xf32, #tpu.memory_space<vmem>>, %arg4: memref<1x8x384xf32, #tpu.memory_space<vmem>>) attributes {dimension_semantics = [#tpu.dimension_semantics<parallel>], iteration_bounds = array<i64: 2>, scalar_prefetch = 0 : i64, scratch_operands = 0 : i64, tpu.core_type = #tpu.core_type<tc>, window_params = [{transform_indices = @transform_0, window_bounds = array<i64: 1, 4, 512>}, {pipeline_mode = #tpu.pipeline_mode<synchronous>, transform_indices = @transform_1, window_bounds = array<i64: 8, 36>}, {pipeline_mode = #tpu.pipeline_mode<synchronous>, transform_indices = @transform_2, window_bounds = array<i64: 8, 1>}, {transform_indices = @transform_3, window_bounds = array<i64: 1, 8, 384>}]} {
    %c0 = arith.constant 0 : index
    %c0_0 = arith.constant 0 : index
    %c0_1 = arith.constant 0 : index
    %0 = vector.load %arg1[%c0, %c0_0, %c0_1] : memref<1x4x512xbf16, #tpu.memory_space<vmem>>, vector<1x4x384xbf16>
    %1 = vector.shape_cast %0 : vector<1x4x384xbf16> to vector<4x384xbf16>
    %c0_2 = arith.constant 0 : index
    %c0_3 = arith.constant 0 : index
    %c1 = arith.constant 1 : index
    %2 = vector.load %arg1[%c0_2, %c0_3, %c1] : memref<1x4x512xbf16, #tpu.memory_space<vmem>>, vector<1x4x384xbf16>
    %3 = vector.shape_cast %2 : vector<1x4x384xbf16> to vector<4x384xbf16>
    %c0_4 = arith.constant 0 : index
    %c0_5 = arith.constant 0 : index
    %c2 = arith.constant 2 : index
    %4 = vector.load %arg1[%c0_4, %c0_5, %c2] : memref<1x4x512xbf16, #tpu.memory_space<vmem>>, vector<1x4x384xbf16>
    %5 = vector.shape_cast %4 : vector<1x4x384xbf16> to vector<4x384xbf16>
    %c0_6 = arith.constant 0 : index
    %c0_7 = arith.constant 0 : index
    %c18 = arith.constant 18 : index
    %6 = vector.load %arg1[%c0_6, %c0_7, %c18] : memref<1x4x512xbf16, #tpu.memory_space<vmem>>, vector<1x4x384xbf16>
    %7 = vector.shape_cast %6 : vector<1x4x384xbf16> to vector<4x384xbf16>
    %c0_8 = arith.constant 0 : index
    %c0_9 = arith.constant 0 : index
    %c19 = arith.constant 19 : index
    %8 = vector.load %arg1[%c0_8, %c0_9, %c19] : memref<1x4x512xbf16, #tpu.memory_space<vmem>>, vector<1x4x384xbf16>
    %9 = vector.shape_cast %8 : vector<1x4x384xbf16> to vector<4x384xbf16>
    %c0_10 = arith.constant 0 : index
    %c0_11 = arith.constant 0 : index
    %c20 = arith.constant 20 : index
    %10 = vector.load %arg1[%c0_10, %c0_11, %c20] : memref<1x4x512xbf16, #tpu.memory_space<vmem>>, vector<1x4x384xbf16>
    %11 = vector.shape_cast %10 : vector<1x4x384xbf16> to vector<4x384xbf16>
    %c0_12 = arith.constant 0 : index
    %c0_13 = arith.constant 0 : index
    %c36 = arith.constant 36 : index
    %12 = vector.load %arg1[%c0_12, %c0_13, %c36] : memref<1x4x512xbf16, #tpu.memory_space<vmem>>, vector<1x4x384xbf16>
    %13 = vector.shape_cast %12 : vector<1x4x384xbf16> to vector<4x384xbf16>
    %c0_14 = arith.constant 0 : index
    %c0_15 = arith.constant 0 : index
    %c37 = arith.constant 37 : index
    %14 = vector.load %arg1[%c0_14, %c0_15, %c37] : memref<1x4x512xbf16, #tpu.memory_space<vmem>>, vector<1x4x384xbf16>
    %15 = vector.shape_cast %14 : vector<1x4x384xbf16> to vector<4x384xbf16>
    %c0_16 = arith.constant 0 : index
    %c0_17 = arith.constant 0 : index
    %c38 = arith.constant 38 : index
    %16 = vector.load %arg1[%c0_16, %c0_17, %c38] : memref<1x4x512xbf16, #tpu.memory_space<vmem>>, vector<1x4x384xbf16>
    %17 = vector.shape_cast %16 : vector<1x4x384xbf16> to vector<4x384xbf16>
    %18 = tpu.concatenate %1, %3, %5, %7, %9, %11, %13, %15, %17 in 0 : vector<4x384xbf16>, vector<4x384xbf16>, vector<4x384xbf16>, vector<4x384xbf16>, vector<4x384xbf16>, vector<4x384xbf16>, vector<4x384xbf16>, vector<4x384xbf16>, vector<4x384xbf16> -> vector<36x384xbf16>
    %c0_18 = arith.constant 0 : index
    %c0_19 = arith.constant 0 : index
    %19 = vector.load %arg2[%c0_18, %c0_19] : memref<8x36xbf16, #tpu.memory_space<vmem>>, vector<8x36xbf16>
    %cst = arith.constant dense<0.000000e+00> : vector<8x384xf32>
    %20 = tpu.matmul %19, %18, %cst {dimension_numbers = #tpu.dot_dimension_numbers<[1], [0], [0], [1], [0, 0, 1, 1], [], []>} : vector<8x36xbf16>, vector<36x384xbf16>, vector<8x384xf32> -> vector<8x384xf32>
    %c0_20 = arith.constant 0 : index
    %c0_21 = arith.constant 0 : index
    %21 = vector.load %arg3[%c0_20, %c0_21] : memref<8x1xf32, #tpu.memory_space<vmem>>, vector<8x1xf32>
    %22 = vector.broadcast %21 : vector<8x1xf32> to vector<8x384xf32>
    %23 = arith.addf %20, %22 : vector<8x384xf32>
    %cst_22 = arith.constant 0.000000e+00 : f32
    %24 = vector.broadcast %cst_22 : f32 to vector<8x384xf32>
    %25 = arith.maximumf %23, %24 : vector<8x384xf32>
    %c0_23 = arith.constant 0 : index
    %c0_24 = arith.constant 0 : index
    %c0_25 = arith.constant 0 : index
    %26 = vector.load %arg4[%c0_23, %c0_24, %c0_25] : memref<1x8x384xf32, #tpu.memory_space<vmem>>, vector<1x8x384xf32>
    %27 = vector.shape_cast %26 : vector<1x8x384xf32> to vector<8x384xf32>
    %28 = vector.shape_cast %25 : vector<8x384xf32> to vector<1x8x384xf32>
    tpu.vector_store %arg4[%c0_23, %c0_24, %c0_25], %28 {strides = array<i32>} : memref<1x8x384xf32, #tpu.memory_space<vmem>>, vector<1x8x384xf32>,
    return
  }
  func.func @transform_0(%arg0: i32) -> (i32, i32, i32) {
    %c0_i32 = arith.constant 0 : i32
    %c0_i32_0 = arith.constant 0 : i32
    %c0_i32_1 = arith.constant 0 : i32
    return %arg0, %c0_i32, %c0_i32_0 : i32, i32, i32
  }
  func.func @transform_1(%arg0: i32) -> (i32, i32) {
    %c0_i32 = arith.constant 0 : i32
    %c0_i32_0 = arith.constant 0 : i32
    %c0_i32_1 = arith.constant 0 : i32
    return %c0_i32, %c0_i32_0 : i32, i32
  }
  func.func @transform_2(%arg0: i32) -> (i32, i32) {
    %c0_i32 = arith.constant 0 : i32
    %c0_i32_0 = arith.constant 0 : i32
    %c0_i32_1 = arith.constant 0 : i32
    return %c0_i32, %c0_i32_0 : i32, i32
  }
  func.func @transform_3(%arg0: i32) -> (i32, i32, i32) {
    %c0_i32 = arith.constant 0 : i32
    %c0_i32_0 = arith.constant 0 : i32
    %c0_i32_1 = arith.constant 0 : i32
    return %arg0, %c0_i32, %c0_i32_0 : i32, i32, i32
  }
}

</mosaic_0001>

<bundles_post_ra>
// kernel: tpu_custom_call.1
= control target key start
LH: loop header
LB: loop body
LE: loop exit
PB: predicated region body
PF: predicated region fallthrough
CT: control target
= control target key end

     0   :  { %8 = vsyncpa [#allocation3], 0  ;;  %s1011_s0 = inlined_call_operand.hbm [shape: bf16[2,4,512], index: 0, kind: input, shape index: {}]   ;;  %s1012_s1 = inlined_call_operand.vmem [shape: bf16[8,36], index: 1, kind: input, shape index: {}]   ;;  %s1013_s2 = inlined_call_operand.vmem [shape: f32[8,1], index: 2, kind: input, shape index: {}]   ;;  %s1014_s3 = inlined_call_operand.hbm [shape: f32[2,8,384], index: 3, kind: output, shape index: {}]  }
   0x1   :  { %10 = vsyncpa [#allocation3 + $0x1], 0 }
   0x2   :  { %11 = vsyncpa [#allocation4], 0 }
   0x3   :  { %13 = vsyncpa [#allocation4 + $0x1], 0  ;;  %s773_s12 = smov 0   ;;  %s775_s13 = smov 0  }
   0x4   :  { %s777_s14 = smov 0   ;;  %s779_s15 = smov 0  }
   0x5 LB: > { %s794_s16 = sadd.s32 4294967295, %s742_s15   ;;  %s572_s17 = sadd.s32 4294967294, %s742_s15   ;;  %s742_s15 = sphi %s779_s15, %s1024_s15   ;;  %s738_s14 = sphi %s777_s14, %s1023_s14   ;;  %s734_s13 = sphi %s775_s13, %s1022_s13   ;;  %s730_s12 = sphi %s773_s12, %s1021_s12  }
   0x6   : > { %s798_s18 = sadd.s32 1, %s742_s15   ;;  %s26_s19 = sadd.s32 1, %s738_s14 }
   0x7   : > { %s23_s20 = ssub.s32 %s742_s15, %s798_s18  ;;  %p33_p0 = scmp.ne.s32.totalorder %s738_s14, %s734_s13 }
   0x8   : > { %p24_p1 = scmp.eq.s32.totalorder %s23_s20, 0  ;;  %p34_p2 = scmp.eq.s32.totalorder %s742_s15, 0 }
   0x9   : > { %p39_p3 = scmp.ne.s32.totalorder %s734_s13, %s730_s12  ;;  %p40_p4 = scmp.eq.s32.totalorder %s794_s16, 0 }
   0xa   : > { %s810_s21 = scalar_select %p24_p1, %s738_s14, %s26_s19  }
   0xb   : > { %p812_p5 = por %p34_p2, %p33_p0  ;;  %p816_p6 = por %p40_p4, %p39_p3 }
   0xc   : > { %p105_p7 = scmp.eq.s32.totalorder %s794_s16, 1  ;;  %p111_p8 = scmp.eq.s32.totalorder %s572_s17, 1 }
   0xd   : > { %p601_p10 = scmp.lt.s32.totalorder %s742_s15, 2  ;;  %s137_s26 = sand.u32 1, %s738_s14  }
   0xe   : > { %p823_p11 = por %p105_p7, %p33_p0  ;;  %p827_p12 = por %p111_p8, %p39_p3 }
   0xf   : > { %s586_s27 = sshll.u32 %s742_s15, 3  ;;  %s575_s28 = sshll.u32 %s137_s26, 3 }
  0x10   : > { %s146_s4 = scalar_lea.hbm %s1011_s0, %s586_s27  ;;  %s141_s6 = scalar_lea.vmem [#allocation2], %s575_s28 }
  0x11   : > { %s148_s5 = sshll.u32 %s146_s4, 4  ;;  %s150_s7 = sshll.u32 %s141_s6, 4  ;;  %s149_s5 = int_to_ptr.hbm [resolvable:$true] %s148_s5  ;;  %s151_s7 = int_to_ptr.vmem [resolvable:$true] %s150_s7 }
  0x12   : > { %p838_p13 = pnand %p601_p10, %p812_p5  ;;  %p578_p0 = scmp.ge.s32.totalorder %s742_s15, 1 }
  0x13   : > { %p155_p1 = scmp.lt.s32.totalorder %s742_s15, 3  ;;  %s138_s9 = scalar_lea.sflag [#allocation3], %s137_s26 }
  0x14   : > { %s646_s10 = sshra.s32 %s149_s5, 4  ;;  %p650_p3 = pneg %p838_p13  ;;  %s647_s10 = int_to_ptr.hbm [resolvable:$true] %s646_s10 }
  0x15   : > { %s648_s11 = scalar_lea.hbm %s647_s10, 8  ;;  %s653_s20 = scalar_lea.hbm %s1011_s0, 16 }
  0x16   : > { %p649_p2 = scmp.ne.s32.totalorder %s647_s10, %s648_s11  ;;  %p654_p5 = scmp.lt.s32.totalorder %s647_s10, %s1011_s0 }
  0x17   : > { %p655_p8 = scmp.lt.s32.totalorder %s653_s20, %s648_s11 }
  0x18   : > { %p651_p4 = pnand %p650_p3, %p649_p2 }
  0x19   : > { %p656_p10 = por %p655_p8, %p654_p5 }
  0x1a   : > { %p652_p7 = pneg %p651_p4 }
  0x1c   : > { %p657_p9 = pnand %p656_p10, %p652_p7 }
  0x1e   : > { %660 = shalt.err (!%p657_p9)
}
  0x1f   : > { %596 = dma.hbm_to_vmem [thread:$0]  (!%p838_p13), %s149_s5, 128, %s151_s7, %s138_s9  }
  0x20   : > { %p156_p2 = pnand %p578_p0, %p155_p1 }
  0x21   : > { %s859_s26 = sand.u32 (!%p156_p2), 1, %s734_s13  }
  0x22   : > { %159 = sbr.rel (%p156_p2) target bundleno = 413 (0x19d), region = 32  ;;  %s579_s28 = sshll.u32 (!%p156_p2), %s859_s26, 3 }
  0x23   : > { %s162_s29 = scalar_lea.sflag (!%p156_p2), [#allocation3], %s859_s26  ;;  %s165_s30 = scalar_lea.vmem (!%p156_p2), [#allocation2], %s579_s28 }
  0x27   : > { %721 = dma.done.wait (%p816_p6), %s162_s29, 128  }
  0x28   : > { %723 = vsyncadd (%p816_p6), %s162_s29, 4294967168  ;;  %v190_v0 = vld [vmem:[%s165_s30] sm:$0x3f]  ;;  %s744_s4 = smov 127   ;;  %s745_s23 = smov 126   ;;  %vm216_vm0 = vcmask 1039360  }
  0x29   : > { %193 = vst [vmem:[#allocation1] ss:$4 sm:$0xff] %v190_v0  ;;  %v191_v1 = vld [vmem:[%s165_s30] sm:$0xff]  ;;  %s746_s5 = smov 110   ;;  %s747_s6 = smov 109   ;;  %vm372_vm1 = vcmask 1041408  }
  0x2a   : > { %s748_s7 = smov 108   ;;  %s749_s8 = smov 92   ;;  %vm238_vm2 = vcmask 1031168   ;;  %vm379_vm3 = vcmask 1043456   ;;  %vm303_vm4 = vcmask 883712   ;;  %vm281_vm5 = vcmask 891904  }
  0x2b   : > { %s750_s9 = smov 91   ;;  %s751_s10 = smov 90   ;;  %vm368_vm6 = vcmask 736256   ;;  %vm325_vm7 = vcmask 752640   ;;  %vm347_vm8 = vcmask 744448   ;;  %vm260_vm9 = vcmask 900096  }
  0x2c   : > { %vm386_vm10 = vcmask 1045504   ;;  %vm427_vm11 = vcmask 293888   ;;  %s587_s22 = smul.u32 24, %s859_s26 }
  0x2d   : > { %s588_s27 = smul.u32 24, %s794_s16  ;;  %s486_s16 = scalar_lea.sflag [#allocation4], %s859_s26 }
  0x2e   : > { %s188_s28 = scalar_lea.vmem [#allocation5], %s587_s22 }
  0x30   : > { %v867_v2 = vld.sshfl [vmem:[#allocation1] sm:$0xff pattern:$0x73625140]  ;;  %v869_v3 = vld.sshfl [vmem:[#allocation1 + $0x8] sm:$0xff pattern:$0x73625140] }
  0x31   : > { %v871_v4 = vld.sshfl [vmem:[#allocation1 + $0x10] sm:$0xff pattern:$0x73625140] }
  0x32   : > { %199 = vst [vmem:[#allocation1 + $0x1] ss:$4 sm:$0xff] %v191_v1 }
  0x39   : > { %v206_v5 = vld.sshfl [vmem:[#allocation1 + $0x18] sm:$0xff pattern:$0x73625140]  ;;  %v204_v6 = vld.sshfl [vmem:[#allocation1 + $0x10] sm:$0xff pattern:$0x73625140] }
  0x3a   : > { %214 = vrot.lane.b32.xlu2 %v206_v5, %s744_s4  ;;  %212 = vrot.lane.b32.xlu1 %v204_v6, %s744_s4  ;;  %v200_v7 = vld.sshfl [vmem:[#allocation1] sm:$0xff pattern:$0x73625140]  ;;  %v202_v8 = vld.sshfl [vmem:[#allocation1 + $0x8] sm:$0xff pattern:$0x73625140] }
  0x3b   : > { %221 = vst [vmem:[#allocation1 + $0x2] ss:$4 sm:$0xff] %v191_v1 }
  0x42   : > { %v222_v9 = vld.sshfl [vmem:[#allocation1] sm:$0xff pattern:$0x73625140]  ;;  %v224_v10 = vld.sshfl [vmem:[#allocation1 + $0x8] sm:$0xff pattern:$0x73625140] }
  0x43   : > { %v228_v11 = vld.sshfl [vmem:[#allocation1 + $0x18] sm:$0xff pattern:$0x73625140]  ;;  %v226_v12 = vld.sshfl [vmem:[#allocation1 + $0x10] sm:$0xff pattern:$0x73625140] }
  0x44   : > { %236 = vrot.lane.b32.xlu0 %v228_v11, %s745_s23  ;;  %234 = vrot.lane.b32.xlu2 %v226_v12, %s745_s23  ;;  %243 = vst [vmem:[#allocation1 + $0x3] ss:$4 sm:$0xff] %v191_v1 }
  0x4b   : > { %v244_v13 = vld.sshfl [vmem:[#allocation1] sm:$0xff pattern:$0x73625140]  ;;  %v246_v14 = vld.sshfl [vmem:[#allocation1 + $0x8] sm:$0xff pattern:$0x73625140] }
  0x4c   : > { %v248_v15 = vld.sshfl [vmem:[#allocation1 + $0x10] sm:$0xff pattern:$0x73625140]  ;;  %v250_v16 = vld.sshfl [vmem:[#allocation1 + $0x18] sm:$0xff pattern:$0x73625140] }
  0x4d   : > { %264 = vst [vmem:[#allocation1] ss:$4 sm:$0xff] %v191_v1  ;;  %256 = vrot.lane.b32.xlu1 %v248_v15, %s746_s5  ;;  %258 = vrot.lane.b32.xlu2 %v250_v16, %s746_s5 }
  0x54   : > { %v265_v17 = vld.sshfl [vmem:[#allocation1] sm:$0xff pattern:$0x73625140]  ;;  %v267_v18 = vld.sshfl [vmem:[#allocation1 + $0x8] sm:$0xff pattern:$0x73625140] }
  0x55   : > { %v269_v19 = vld.sshfl [vmem:[#allocation1 + $0x10] sm:$0xff pattern:$0x73625140]  ;;  %v271_v20 = vld.sshfl [vmem:[#allocation1 + $0x18] sm:$0xff pattern:$0x73625140]  ;;  %273 = vrot.lane.b32.xlu0 %v265_v17, %s747_s6 }
  0x56   : > { %286 = vst [vmem:[#allocation1 + $0x1] ss:$4 sm:$0xff] %v191_v1  ;;  %277 = vrot.lane.b32.xlu1 %v269_v19, %s747_s6 }
  0x5d   : > { %v287_v21 = vld.sshfl [vmem:[#allocation1] sm:$0xff pattern:$0x73625140]  ;;  %v291_v22 = vld.sshfl [vmem:[#allocation1 + $0x10] sm:$0xff pattern:$0x73625140] }
  0x5e   : > { %279 = vrot.lane.b32.xlu1 %v271_v20, %s747_s6  ;;  %299 = vrot.lane.b32.xlu2 %v291_v22, %s748_s7  ;;  %v289_v23 = vld.sshfl [vmem:[#allocation1 + $0x8] sm:$0xff pattern:$0x73625140]  ;;  %v293_v24 = vld.sshfl [vmem:[#allocation1 + $0x18] sm:$0xff pattern:$0x73625140] }
  0x5f   : > { %297 = vrot.lane.b32.xlu0 %v289_v23, %s748_s7  ;;  %308 = vst [vmem:[#allocation1 + $0x2] ss:$4 sm:$0xff] %v191_v1 }
  0x66   : > { %275 = vrot.lane.b32.xlu1 %v267_v18, %s747_s6  ;;  %301 = vrot.lane.b32.xlu2 %v293_v24, %s748_s7  ;;  %v313_v25 = vld.sshfl [vmem:[#allocation1 + $0x10] sm:$0xff pattern:$0x73625140]  ;;  %v315_v26 = vld.sshfl [vmem:[#allocation1 + $0x18] sm:$0xff pattern:$0x73625140] }
  0x67   : > { %321 = vrot.lane.b32.xlu0 %v313_v25, %s749_s8  ;;  %v311_v27 = vld.sshfl [vmem:[#allocation1 + $0x8] sm:$0xff pattern:$0x73625140]  ;;  %v309_v28 = vld.sshfl [vmem:[#allocation1] sm:$0xff pattern:$0x73625140] }
  0x68   : > { %330 = vst [vmem:[#allocation1 + $0x3] ss:$4 sm:$0xff] %v191_v1 }
  0x6e   : > { %295 = vrot.lane.b32.xlu2 %v287_v21, %s748_s7  ;;  %323 = vrot.lane.b32.xlu1 %v315_v26, %s749_s8 }
  0x6f   : > { %210 = vrot.lane.b32.xlu0 %v202_v8, %s744_s4  ;;  %v337_v29 = vld.sshfl [vmem:[#allocation1 + $0x18] sm:$0xff pattern:$0x73625140]  ;;  %v335_v30 = vld.sshfl [vmem:[#allocation1 + $0x10] sm:$0xff pattern:$0x73625140] }
  0x70   : > { %v331_v31 = vld.sshfl [vmem:[#allocation1] sm:$0xff pattern:$0x73625140]  ;;  %v333_v32 = vld.sshfl [vmem:[#allocation1 + $0x8] sm:$0xff pattern:$0x73625140] }
  0x71   : > { %351 = vst [vmem:[#allocation1] ss:$4 sm:$0xff] %v191_v1  ;;  %v421_v8 = vld [vmem:[%s1013_s2] sm:$0xff] }
  0x76   : > { %319 = vrot.lane.b32.xlu2 %v311_v27, %s749_s8  ;;  %317 = vrot.lane.b32.xlu1 %v309_v28, %s749_s8 }
  0x77   : > { %345 = vrot.lane.b32.xlu0 %v337_v29, %s750_s9 }
  0x78   : > { %v356_v33 = vld.sshfl [vmem:[#allocation1 + $0x10] sm:$0xff pattern:$0x73625140]  ;;  %v354_v34 = vld.sshfl [vmem:[#allocation1 + $0x8] sm:$0xff pattern:$0x73625140] }
  0x79   : > { %v358_v35 = vld.sshfl [vmem:[#allocation1 + $0x18] sm:$0xff pattern:$0x73625140]  ;;  %v352_v36 = vld.sshfl [vmem:[#allocation1] sm:$0xff pattern:$0x73625140] }
  0x7e   : > { %230 = vrot.lane.b32.xlu1 %v222_v9, %s745_s23  ;;  %343 = vrot.lane.b32.xlu2 %v335_v30, %s750_s9 }
  0x7f   : > { %339 = vrot.lane.b32.xlu0 %v331_v31, %s750_s9 }
  0x86   : > { %208 = vrot.lane.b32.xlu2 %v200_v7, %s744_s4  ;;  %341 = vrot.lane.b32.xlu1 %v333_v32, %s750_s9  ;;  %s497_s4 = scalar_lea.hbm %s1014_s3, %s588_s27 }
  0x87   : > { %364 = vrot.lane.b32.xlu0 %v356_v33, %s751_s10 }
  0x8e   : > { %232 = vrot.lane.b32.xlu2 %v224_v10, %s745_s23  ;;  %362 = vrot.lane.b32.xlu1 %v354_v34, %s751_s10  ;;  %v752_v10 = vmov 0   ;;  %s499_s23 = sshll.u32 %s188_s28, 4  ;;  %s500_s23 = int_to_ptr.vmem [resolvable:$true] %s499_s23 }
  0x8f   : > { %366 = vrot.lane.b32.xlu0 %v358_v35, %s751_s10  ;;  %644 = vset.pattern.permute.xlu2 %v752_v10 }
  0x90   : > { %645 = vset.pattern.permute.xlu0 %v752_v10 }
  0x94   : > { %v215_v37 = vpop.permute.xlu2 %214 }
  0x96   : > { %254 = vrot.lane.b32.xlu1 %v246_v14, %s746_s5  ;;  %424 = vperm.xlu2 %644, %v421_v8  }
  0x97   : > { %360 = vrot.lane.b32.xlu0 %v352_v36, %s751_s10  ;;  %s696_s10 = scalar_lea.hbm %s1014_s3, 48 }
  0x9e   : > { %v235_v38 = vpop.permute.xlu2 %234 }
  0x9f   : > { %252 = vrot.lane.b32.xlu0 %v244_v13, %s746_s5  ;;  %s501_s5 = sshll.u32 %s497_s4, 4  ;;  %s502_s5 = int_to_ptr.hbm [resolvable:$true] %s501_s5 }
  0xa0   : > { %s690_s6 = sshra.s32 %s502_s5, 4  ;;  %s691_s6 = int_to_ptr.hbm [resolvable:$true] %s690_s6 }
  0xa1   : > { %s692_s7 = scalar_lea.hbm %s691_s6, 24  ;;  %p697_p0 = scmp.lt.s32.totalorder %s691_s6, %s1014_s3 }
  0xa2   : > { %p693_p6 = scmp.ne.s32.totalorder %s691_s6, %s692_s7  ;;  %p698_p1 = scmp.lt.s32.totalorder %s696_s10, %s692_s7 }
  0xa4   : > { %p694_p9 = pnand %p693_p6, %p823_p11  ;;  %p699_p3 = por %p698_p1, %p697_p0 }
  0xa6   : > { %p695_p13 = pneg %p694_p9 }
  0xa7   : > { %v886_v41 = vpop.permute.xlu2 %258 }
  0xa8   : > { %p700_p4 = pnand %p699_p3, %p695_p13 }
  0xac   : > { %v213_v39 = vpop.permute.xlu1 %212 }
  0xad   : > { %v219_v40 = vsel %vm216_vm0, %v213_v39, %v215_v37 }
  0xae   : > { %v378_v42 = vsel %vm372_vm1, %v871_v4, %v219_v40 }
  0xb6   : > { %v237_v43 = vpop.permute.xlu0 %236 }
  0xb7   : > { %v241_v44 = vsel %vm238_vm2, %v235_v38, %v237_v43 }
  0xb8   : > { %v300_v45 = vpop.permute.xlu2 %299  ;;  %v892_v46 = vsel %vm379_vm3, %v378_v42, %v241_v44 }
  0xbf   : > { %v894_v47 = vpop.permute.xlu1 %256 }
  0xc0   : > { %v302_v48 = vpop.permute.xlu2 %301  ;;  %v263_v31 = vsel %vm260_vm9, %v894_v47, %v886_v41  ;;  %v420_v41 = vld [vmem:[%s1012_s1] sm:$0xf] }
  0xc1   : > { %v306_v12 = vsel %vm303_vm4, %v300_v45, %v302_v48  ;;  %v394_v40 = vsel %vm386_vm10, %v892_v46, %v263_v31 }
  0xc7   : > { %v896_v49 = vpop.permute.xlu0 %273 }
  0xc8   : > { %v278_v50 = vpop.permute.xlu1 %277  ;;  %v898_v51 = vpop.permute.xlu2 %295 }
  0xd0   : > { %v280_v52 = vpop.permute.xlu1 %279  ;;  %v900_v53 = vpop.permute.xlu2 %319 }
  0xd1   : > { %v902_v54 = vpop.permute.xlu0 %297  ;;  %v284_v14 = vsel %vm281_vm5, %v278_v50, %v280_v52 }
  0xd2   : > { %v305_v15 = vsel %vm303_vm4, %v902_v54, %v300_v45  ;;  %v404_v26 = vsel %vm372_vm1, %v284_v14, %v306_v12  ;;  %v304_v42 = vsel %vm303_vm4, %v898_v51, %v902_v54 }
  0xd8   : > { %v276_v55 = vpop.permute.xlu1 %275  ;;  %v344_v56 = vpop.permute.xlu2 %343 }
  0xd9   : > { %v322_v57 = vpop.permute.xlu0 %321  ;;  %v282_v35 = vsel %vm281_vm5, %v896_v49, %v276_v55 }
  0xda   : > { %v327_v19 = vsel %vm325_vm7, %v900_v53, %v322_v57  ;;  %v398_v44 = vsel %vm372_vm1, %v282_v35, %v304_v42 }
  0xe0   : > { %v324_v58 = vpop.permute.xlu1 %323  ;;  %v904_v59 = vpop.permute.xlu2 %208 }
  0xe1   : > { %v906_v60 = vpop.permute.xlu0 %210  ;;  %v328_v22 = vsel %vm325_vm7, %v322_v57, %v324_v58 }
  0xe2   : > { %v218_v61 = vsel %vm216_vm0, %v906_v60, %v213_v39  ;;  %v410_v29 = vsel %vm379_vm3, %v404_v26, %v328_v22  ;;  %v217_v45 = vsel %vm216_vm0, %v904_v59, %v906_v60 }
  0xe3   : > { %v376_v0 = vsel %vm372_vm1, %v869_v3, %v218_v61  ;;  %v283_v3 = vsel %vm281_vm5, %v276_v55, %v278_v50  ;;  %v374_v49 = vsel %vm372_vm1, %v867_v2, %v217_v45 }
  0xe4   : > { %v401_v18 = vsel %vm372_vm1, %v283_v3, %v305_v15 }
  0xe5   : > { %v408_v27 = vsel %vm379_vm3, %v401_v18, %v327_v19 }
  0xe8   : > { %v318_v62 = vpop.permute.xlu1 %317  ;;  %v910_v63 = vpop.permute.xlu2 %232 }
  0xe9   : > { %v346_v1 = vpop.permute.xlu0 %345  ;;  %v240_v4 = vsel %vm238_vm2, %v910_v63, %v235_v38  ;;  %v326_v38 = vsel %vm325_vm7, %v318_v62, %v900_v53 }
  0xea   : > { %v383_v5 = vsel %vm379_vm3, %v376_v0, %v240_v4  ;;  %v350_v25 = vsel %vm347_vm8, %v344_v56, %v346_v1  ;;  %v406_v46 = vsel %vm379_vm3, %v398_v44, %v326_v38 }
  0xeb   : > { %v418_v30 = vsel %vm386_vm10, %v410_v29, %v350_v25 }
  0xf0   : > { %v231_v6 = vpop.permute.xlu1 %230  ;;  %v425_v54 = vpop.permute.xlu2 %424 }
  0xf1   : > { %v340_v7 = vpop.permute.xlu0 %339 }
  0xf8   : > { %v342_v9 = vpop.permute.xlu1 %341 }
  0xf9   : > { %v365_v11 = vpop.permute.xlu0 %364  ;;  %v349_v23 = vsel %vm347_vm8, %v342_v9, %v344_v56  ;;  %v348_v43 = vsel %vm347_vm8, %v340_v7, %v342_v9 }
  0xfa   : > { %v415_v28 = vsel %vm386_vm10, %v408_v27, %v349_v23  ;;  %v412_v48 = vsel %vm386_vm10, %v406_v46, %v348_v43 }
 0x100   : > { %v363_v13 = vpop.permute.xlu1 %362 }
 0x101   : > { %v367_v16 = vpop.permute.xlu0 %366  ;;  %v370_v17 = vsel %vm368_vm6, %v363_v13, %v365_v11 }
 0x102   : > { %v435_v20 = vsel %vm372_vm1, %v370_v17, 0  ;;  %v371_v21 = vsel %vm368_vm6, %v365_v11, %v367_v16 }
 0x103   : > { %458 = vmatpush.bf16.msra.mxu1 %v435_v20  ;;  %v438_v24 = vsel %vm372_vm1, %v371_v21, 0 }
 0x104   : > { %471 = vmatpush.bf16.msra.mxu2 %v438_v24 }
 0x107   : > { %459 = vmatpush.bf16.msra.mxu1 %v415_v28 }
 0x108   : > { %472 = vmatpush.bf16.msra.mxu2 %v418_v30  ;;  %v255_v32 = vpop.permute.xlu1 %254 }
 0x109   : > { %v262_v33 = vsel %vm260_vm9, %v255_v32, %v894_v47  ;;  %v361_v34 = vpop.permute.xlu0 %360  ;;  %v239_v47 = vsel %vm238_vm2, %v231_v6, %v910_v63 }
 0x10a   : > { %v369_v36 = vsel %vm368_vm6, %v361_v34, %v363_v13  ;;  %v391_v37 = vsel %vm386_vm10, %v383_v5, %v262_v33  ;;  %v381_v52 = vsel %vm379_vm3, %v374_v49, %v239_v47 }
 0x10b   : > { %v432_v39 = vsel %vm372_vm1, %v369_v36, 0  ;;  %460 = vmatpush.bf16.msra.mxu1 %v391_v37 }
 0x10c   : > { %445 = vmatpush.bf16.msra.mxu0 %v432_v39  ;;  %473 = vmatpush.bf16.msra.mxu2 %v394_v40 }
 0x10e   : > { %581 = vmatmul.msk.bf16.vlgmr.msra.gmra.mxu1 %vm427_vm11, %v420_v41 }
 0x10f   : > { %582 = vmatmul.msk.bf16.vlgmr.msra.gmra.mxu2 %vm427_vm11, %v420_v41 }
 0x110   : > { %446 = vmatpush.bf16.msra.mxu0 %v412_v48 }
 0x111   : > { %v253_v50 = vpop.permute.xlu0 %252 }
 0x112   : > { %v261_v51 = vsel %vm260_vm9, %v253_v50, %v255_v32 }
 0x113   : > { %v388_v53 = vsel %vm386_vm10, %v381_v52, %v261_v51 }
 0x114   : > { %447 = vmatpush.bf16.msra.mxu0 %v388_v53 }
 0x117   : > { %580 = vmatmul.msk.bf16.vlgmr.msra.gmra.mxu0 %vm427_vm11, %v420_v41 }
 0x18b   : > { %v462_v55 = vpop.f32.mrf.mxu1 }
 0x18c   : > { %v463_v56 = vadd.f32 %v462_v55, %v425_v54 }
 0x18e   : > { %v480_v57 = vmax.f32 %v463_v56, 0.0 }
 0x190   : > { %483 = vst [vmem:[%s188_s28 + $0x8] sm:$0xff] %v480_v57 }
 0x192   : > { %v475_v2 = vpop.f32.mrf.mxu2 }
 0x193   : > { %v476_v58 = vadd.f32 %v475_v2, %v425_v54  ;;  %v464_v59 = vpop.f32.mrf.mxu1 }
 0x194   : > { %v449_v60 = vpop.f32.mrf.mxu0 }
 0x195   : > { %v481_v61 = vmax.f32 %v476_v58, 0.0  ;;  %v450_v62 = vadd.f32 %v449_v60, %v425_v54 }
 0x197   : > { %484 = vst [vmem:[%s188_s28 + $0x10] sm:$0xff] %v481_v61  ;;  %v479_v63 = vmax.f32 %v450_v62, 0.0 }
 0x199   : > { %482 = vst [vmem:[%s188_s28] sm:$0xff] %v479_v63 }
 0x19a   : > { %v477_v0 = vpop.f32.mrf.mxu2 }
 0x19b   : > { %703 = shalt.err (!%p700_p4)
}
 0x19c   : > { %591 = dma.vmem_to_hbm [thread:$0]  (%p823_p11), %s500_s23, 384, %s502_s5, %s486_s16   ;;  %v451_v1 = vpop.f32.mrf.mxu0 }
 0x19d PF: > { %s513_s26 = sand.u32 1, %s730_s12   ;;  %p1020_p7 = scmp.ge.s32.totalorder %s742_s15, 2 }
 0x19e   : > { %s514_s19 = scalar_lea.sflag [#allocation4], %s513_s26 }
 0x19f   : > { %p598_p5 = pnand %p1020_p7, %p827_p12 }
 0x1a1   : > { %p599_p8 = pneg %p598_p5 }
 0x1a3   : > { %725 = dma.done.wait (%p599_p8), %s514_s19, 384  }
 0x1a4   : > { %727 = vsyncadd (%p599_p8), %s514_s19, 4294966912  ;;  %p16_p10 = scmp.ge.s32.totalorder %s798_s18, 4   ;;  %s1021_s12 = smov %s734_s13 }
 0x1a5   : > { %s1022_s13 = smov %s738_s14  ;;  %s1023_s14 = smov %s810_s21 }
 0x1a6   : > { %s1024_s15 = smov %s798_s18  ;;  %18 = sbr.rel (!%p16_p10) target bundleno = 5 (0x5), region = 83 }
 0x1ab   :  { %520 = vsyncpa [#allocation3], 1 }
 0x1ac   :  { %522 = vsyncpa [#allocation3 + $0x1], 1 }
 0x1ad   :  { %523 = vsyncpa [#allocation4], 1 }
 0x1ae   :  { %525 = vsyncpa [#allocation4 + $0x1], 1 }

</bundles_post_ra>
